<compile_context>
chip_gen: v7x
topology: tpu7x:2x2x1
jax: 0.10.0
libtpu: 0.0.40
codegen_flags: <defaults>
</compile_context>

<pallas_src>
import jax
import jax.numpy as jnp
from jax.experimental import pallas as pl
from jax.experimental.pallas import tpu as pltpu

LANE = 128   # lane width / padded channel dim
C_IN = 1
HID1 = 32
HID2 = 64
C_OUT = 1


def _round_up(v, m):
    return ((v + m - 1) // m) * m


def _vmem_limit_bytes():
    """Generation-dependent scoped-VMEM budget (~75% of physical capacity)."""
    cap = None
    try:
        cap = getattr(pltpu.get_tpu_info(), "vmem_capacity_bytes", None)
    except Exception:
        cap = None
    if not cap:
        cap = 64 * 1024 * 1024          # conservative fallback (v7x-sized)
    return int(cap) * 3 // 4


# ------------------------------ kernels ------------------------------------

def gcnnet_fused_kernel(p_ref, x_ref, w1_ref, b1_ref, w2_ref, b2_ref,
                        wfc_ref, bfc_ref, out_ref, h1_ref):
    """Single-call path: P resident in VMEM (read from HBM exactly once).

    Grid axis 0 walks output row tiles sequentially ("arbitrary"): step 0
    materializes the full h1 into a VMEM scratch, later steps reuse it.
    """
    i = pl.program_id(0)
    tile_m = out_ref.shape[0]

    @pl.when(i == 0)
    def _():
        # Layer 1, Cin == 1: weight multiply is a rank-1 outer product done on
        # the VPU (px * w1) instead of a K=1 MXU matmul.
        px = jnp.dot(p_ref[...], x_ref[...],
                     preferred_element_type=jnp.float32)            # (n_pad, 1)
        h1 = jnp.maximum(px * w1_ref[...] + b1_ref[...], 0.0)       # (n_pad, 128)
        # Padded rows (>= n) evaluate to relu(b1); harmless because the
        # matching padded COLUMNS of P are zero, so they never feed layer 2.
        h1_ref[...] = h1.astype(h1_ref.dtype)                       # stays in VMEM

    # Layer 2 + fc for this row tile, sliced out of the resident P block.
    row0 = pl.multiple_of(i * tile_m, tile_m)
    p_rows = p_ref[pl.ds(row0, tile_m), :]                          # (tile_m, n_pad) bf16
    ph1 = jnp.dot(p_rows, h1_ref[...],
                  preferred_element_type=jnp.float32)               # (tile_m, 128) f32
    z2 = jnp.dot(ph1.astype(jnp.bfloat16), w2_ref[...],
                 preferred_element_type=jnp.float32)
    h2 = jnp.maximum(z2 + b2_ref[...], 0.0)                         # f32 elementwise
    out = jnp.dot(h2.astype(jnp.bfloat16), wfc_ref[...],
                  preferred_element_type=jnp.float32)
    out_ref[...] = (out + bfc_ref[...]).astype(out_ref.dtype)       # lane-dense store


def gcn_layer1_tiled_kernel(p_ref, x_ref, w1_ref, b1_ref, h1_ref, px_acc):
    """h1[i] = relu((sum_k P[i,k] @ x[k]) * w1 + b1), K-tiled accumulation."""
    k = pl.program_id(1)

    @pl.when(k == 0)
    def _():
        px_acc[...] = jnp.zeros_like(px_acc)

    px_acc[...] += jnp.dot(p_ref[...], x_ref[...],
                           preferred_element_type=jnp.float32)      # (tile_m, 1)

    @pl.when(k == pl.num_programs(1) - 1)
    def _():
        h1 = jnp.maximum(px_acc[...] * w1_ref[...] + b1_ref[...], 0.0)
        h1_ref[...] = h1.astype(h1_ref.dtype)


def gcn_layer2_fc_tiled_kernel(p_ref, h1_ref, w2_ref, b2_ref, wfc_ref, bfc_ref,
                               out_ref, acc_ref):
    """out[i] = relu((sum_k P[i,k] @ h1[k]) @ W2 + b2) @ Wfc + bfc."""
    k = pl.program_id(1)

    @pl.when(k == 0)
    def _():
        acc_ref[...] = jnp.zeros_like(acc_ref)

    acc_ref[...] += jnp.dot(p_ref[...], h1_ref[...],
                            preferred_element_type=jnp.float32)     # (tile_m, 128)

    @pl.when(k == pl.num_programs(1) - 1)
    def _():
        z2 = jnp.dot(acc_ref[...].astype(jnp.bfloat16), w2_ref[...],
                     preferred_element_type=jnp.float32)
        h2 = jnp.maximum(z2 + b2_ref[...], 0.0)
        out = jnp.dot(h2.astype(jnp.bfloat16), wfc_ref[...],
                      preferred_element_type=jnp.float32)
        out_ref[...] = (out + bfc_ref[...]).astype(out_ref.dtype)


# ----------------------------- prep (hoisted glue) ---------------------------

def prepare_params(params):
    """Pad/cast weights to lane-aligned, MXU-friendly layouts (once per model)."""
    w1 = jnp.zeros((C_IN, LANE), jnp.float32).at[:, :HID1].set(params["w1"])
    b1 = jnp.zeros((1, LANE), jnp.float32).at[:, :HID1].set(params["b1"])
    w2 = (jnp.zeros((LANE, LANE), jnp.float32)
          .at[:HID1, :HID2].set(params["w2"]).astype(jnp.bfloat16))
    b2 = jnp.zeros((1, LANE), jnp.float32).at[:, :HID2].set(params["b2"])
    wfc = (jnp.zeros((LANE, LANE), jnp.float32)
           .at[:HID2, :C_OUT].set(params["wfc"]).astype(jnp.bfloat16))
    bfc = jnp.zeros((1, LANE), jnp.float32).at[:, :C_OUT].set(params["bfc"])
    return {"w1": w1, "b1": b1, "w2": w2, "b2": b2, "wfc": wfc, "bfc": bfc}


def build_gcn_propagation(edge_index, num_nodes):
    """Dense P = D^{-1/2} (A + I) D^{-1/2} (PyG GCNConv default normalization)."""
    src, dst = edge_index
    A = jnp.zeros((num_nodes, num_nodes), jnp.float32).at[src, dst].set(1.0)
    A = A + jnp.eye(num_nodes, dtype=jnp.float32)          # add_self_loops=True
    deg = A.sum(axis=1)
    d_inv_sqrt = jnp.where(deg > 0, 1.0 / jnp.sqrt(jnp.maximum(deg, 1e-12)), 0.0)
    return d_inv_sqrt[:, None] * A * d_inv_sqrt[None, :]


def prepare_propagation(P):
    """Pad P to a lane-aligned square and cast to bf16 (once per graph; hoisted
    out of the forward so repeated inference does not re-pay ~3*n_pad^2 B)."""
    n = P.shape[0]
    n_pad = _round_up(max(n, LANE), LANE)
    return (jnp.zeros((n_pad, n_pad), jnp.float32).at[:n, :n].set(P)
            .astype(jnp.bfloat16))


# ------------------------------ forward -------------------------------------

def gcnnet_forward(P_pad, x, prepped, *, force_tiled=False,
                   tile_m=None, tile_k=None):
    """GcnNet forward.  P_pad = prepare_propagation(P); prepped = prepare_params()."""
    n = x.shape[0]
    n_pad = P_pad.shape[0]
    x_p = jnp.zeros((n_pad, C_IN), jnp.float32).at[:n].set(x).astype(jnp.bfloat16)

    vmem_limit = _vmem_limit_bytes()
    if tile_m is None:
        tile_m = max(t for t in (512, 256, 128) if n_pad % t == 0)

    # Fused path is valid whenever (conservatively double-counted) bf16 P plus
    # the h1 scratch and small tiles fit the scoped-VMEM budget.
    resident_bytes = 2 * (n_pad * n_pad * 2) + n_pad * LANE * 2 + (4 << 20)
    use_fused = (not force_tiled) and resident_bytes <= vmem_limit

    if use_fused:
        out_pad = pl.pallas_call(
            gcnnet_fused_kernel,
            out_shape=jax.ShapeDtypeStruct((n_pad, LANE), jnp.float32),
            grid=(n_pad // tile_m,),
            in_specs=[
                pl.BlockSpec((n_pad, n_pad), lambda i: (0, 0)),   # P resident: 1 HBM read
                pl.BlockSpec((n_pad, C_IN), lambda i: (0, 0)),
                pl.BlockSpec((1, LANE), lambda i: (0, 0)),
                pl.BlockSpec((1, LANE), lambda i: (0, 0)),
                pl.BlockSpec((LANE, LANE), lambda i: (0, 0)),
                pl.BlockSpec((1, LANE), lambda i: (0, 0)),
                pl.BlockSpec((LANE, LANE), lambda i: (0, 0)),
                pl.BlockSpec((1, LANE), lambda i: (0, 0)),
            ],
            out_specs=pl.BlockSpec((tile_m, LANE), lambda i: (i, 0)),
            scratch_shapes=[pltpu.VMEM((n_pad, LANE), jnp.bfloat16)],  # h1: never hits HBM
            compiler_params=pltpu.CompilerParams(
                # h1 scratch is carried across row tiles -> sequential axis.
                dimension_semantics=("arbitrary",),
                vmem_limit_bytes=vmem_limit),
        )(P_pad, x_p, prepped["w1"], prepped["b1"], prepped["w2"],
          prepped["b2"], prepped["wfc"], prepped["bfc"])
        return out_pad[:n, :C_OUT]

    # ---- K-tiled streaming fallback: VMEM bounded by tile size, not graph ----
    if tile_k is None:
        tile_k = max(t for t in (2048, 1024, 512, 256, 128) if n_pad % t == 0)
    grid = (n_pad // tile_m, n_pad // tile_k)
    cparams = pltpu.CompilerParams(
        dimension_semantics=("parallel", "arbitrary"),   # row tiles across v7x TCs
        vmem_limit_bytes=vmem_limit)

    h1 = pl.pallas_call(
        gcn_layer1_tiled_kernel,
        out_shape=jax.ShapeDtypeStruct((n_pad, LANE), jnp.bfloat16),
        grid=grid,
        in_specs=[
            pl.BlockSpec((tile_m, tile_k), lambda i, k: (i, k)),
            pl.BlockSpec((tile_k, C_IN), lambda i, k: (k, 0)),
            pl.BlockSpec((1, LANE), lambda i, k: (0, 0)),
            pl.BlockSpec((1, LANE), lambda i, k: (0, 0)),
        ],
        out_specs=pl.BlockSpec((tile_m, LANE), lambda i, k: (i, 0)),
        scratch_shapes=[pltpu.VMEM((tile_m, C_IN), jnp.float32)],
        compiler_params=cparams,
    )(P_pad, x_p, prepped["w1"], prepped["b1"])

    out_pad = pl.pallas_call(
        gcn_layer2_fc_tiled_kernel,
        out_shape=jax.ShapeDtypeStruct((n_pad, LANE), jnp.float32),
        grid=grid,
        in_specs=[
            pl.BlockSpec((tile_m, tile_k), lambda i, k: (i, k)),
            pl.BlockSpec((tile_k, LANE), lambda i, k: (k, 0)),
            pl.BlockSpec((LANE, LANE), lambda i, k: (0, 0)),
            pl.BlockSpec((1, LANE), lambda i, k: (0, 0)),
            pl.BlockSpec((LANE, LANE), lambda i, k: (0, 0)),
            pl.BlockSpec((1, LANE), lambda i, k: (0, 0)),
        ],
        out_specs=pl.BlockSpec((tile_m, LANE), lambda i, k: (i, 0)),
        scratch_shapes=[pltpu.VMEM((tile_m, LANE), jnp.float32)],
        compiler_params=cparams,
    )(P_pad, h1, prepped["w2"], prepped["b2"], prepped["wfc"], prepped["bfc"])

    return out_pad[:n, :C_OUT]


# ----------------------------- reference & init ------------------------------

def gcnnet_reference(P, x, params):
    """Pure-JAX f32 reference with identical semantics."""
    h1 = jax.nn.relu(P @ (x @ params["w1"]) + params["b1"])
    h2 = jax.nn.relu(P @ (h1 @ params["w2"]) + params["b2"])
    return h2 @ params["wfc"] + params["bfc"]


def glorot(key, shape):
    fan_in, fan_out = shape[-2], shape[-1]
    limit = (6.0 / (fan_in + fan_out)) ** 0.5
    return jax.random.uniform(key, shape, jnp.float32, -limit, limit)


def init_params(key):
    k1, k2, k3, k4 = jax.random.split(key, 4)
    bound = 1.0 / (HID2 ** 0.5)
    return {
        # GCNConv(1, 32): glorot weight, zero bias (PyG defaults)
        "w1": glorot(k1, (C_IN, HID1)),
        "b1": jnp.zeros((1, HID1), jnp.float32),
        # GCNConv(32, 64)
        "w2": glorot(k2, (HID1, HID2)),
        "b2": jnp.zeros((1, HID2), jnp.float32),
        # Linear(64, 1)
        "wfc": glorot(k3, (HID2, C_OUT)),
        "bfc": jax.random.uniform(k4, (1, C_OUT), jnp.float32, -bound, bound),
    }


if __name__ == "__main__":
    key = jax.random.PRNGKey(0)
    k_x1, k_x2, k_p = jax.random.split(key, 3)

    params = init_params(k_p)
    prepped = prepare_params(params)          # hoisted: once per model

    def make_graph(n, k_feat):
        # deterministic small graph: undirected ring + a couple of chords
        ring_src = list(range(n)) + [(i + 1) % n for i in range(n)]
        ring_dst = [(i + 1) % n for i in range(n)] + list(range(n))
        chord_src = [0, n // 2, n // 4, 3 * n // 4]
        chord_dst = [n // 2, 0, 3 * n // 4, n // 4]
        edge_index = jnp.array([ring_src + chord_src, ring_dst + chord_dst],
                               jnp.int32)
        x = jax.random.normal(k_feat, (n, 1), jnp.float32)   # data.x_tmp: [N, 1]
        return edge_index, x

    def run_and_check(n, k_feat, force_tiled):
        edge_index, x = make_graph(n, k_feat)
        P = build_gcn_propagation(edge_index, n)
        P_pad = prepare_propagation(P)        # hoisted: once per graph
        out = gcnnet_forward(P_pad, x, prepped, force_tiled=force_tiled)
        out = jax.block_until_ready(out)
        assert out.shape == (n, 1) and out.dtype == jnp.float32
        ref = gcnnet_reference(P, x, params)
        abs_err = float(jnp.max(jnp.abs(out - ref)))
        tol = 3e-2 * float(jnp.max(jnp.abs(ref))) + 5e-3    # bf16-MXU tolerance
        assert abs_err < tol, \
            f"mismatch (n={n}, tiled={force_tiled}): {abs_err} >= {tol}"

    # Small graph (N=16): fused single-call path with P resident in VMEM.
    run_and_check(16, k_x1, force_tiled=False)
    # Larger graph (N=300) forced through the K-tiled streaming fallback path.
    run_and_check(300, k_x2, force_tiled=True)

    print("KERNEL_OK")
</pallas_src>

<mosaic_0001>
module attributes {stable_mosaic.version = 11 : i64} {
  func.func @gcnnet_fused_kernel(%arg0: i32, %arg1: memref<128x128xbf16, #tpu.memory_space<vmem>>, %arg2: memref<128x1xbf16, #tpu.memory_space<vmem>>, %arg3: memref<1x128xf32, #tpu.memory_space<vmem>>, %arg4: memref<1x128xf32, #tpu.memory_space<vmem>>, %arg5: memref<128x128xbf16, #tpu.memory_space<vmem>>, %arg6: memref<1x128xf32, #tpu.memory_space<vmem>>, %arg7: memref<128x128xbf16, #tpu.memory_space<vmem>>, %arg8: memref<1x128xf32, #tpu.memory_space<vmem>>, %arg9: memref<128x128xf32, #tpu.memory_space<vmem>>, %arg10: memref<128x128xbf16, #tpu.memory_space<vmem>>) attributes {dimension_semantics = [#tpu.dimension_semantics<arbitrary>], iteration_bounds = array<i64: 1>, scalar_prefetch = 0 : i64, scratch_operands = 1 : i64, tpu.core_type = #tpu.core_type<tc>, window_params = [{pipeline_mode = #tpu.pipeline_mode<synchronous>, transform_indices = @transform_0, window_bounds = array<i64: 128, 128>}, {pipeline_mode = #tpu.pipeline_mode<synchronous>, transform_indices = @transform_1, window_bounds = array<i64: 128, 1>}, {pipeline_mode = #tpu.pipeline_mode<synchronous>, transform_indices = @transform_2, window_bounds = array<i64: 1, 128>}, {pipeline_mode = #tpu.pipeline_mode<synchronous>, transform_indices = @transform_3, window_bounds = array<i64: 1, 128>}, {pipeline_mode = #tpu.pipeline_mode<synchronous>, transform_indices = @transform_4, window_bounds = array<i64: 128, 128>}, {pipeline_mode = #tpu.pipeline_mode<synchronous>, transform_indices = @transform_5, window_bounds = array<i64: 1, 128>}, {pipeline_mode = #tpu.pipeline_mode<synchronous>, transform_indices = @transform_6, window_bounds = array<i64: 128, 128>}, {pipeline_mode = #tpu.pipeline_mode<synchronous>, transform_indices = @transform_7, window_bounds = array<i64: 1, 128>}, {transform_indices = @transform_8, window_bounds = array<i64: 128, 128>}]} {
    %c0_i32 = arith.constant 0 : i32
    %0 = arith.cmpi eq, %arg0, %c0_i32 : i32
    %1 = arith.extui %0 : i1 to i32
    %c0_i32_0 = arith.constant 0 : i32
    %2 = arith.cmpi ne, %1, %c0_i32_0 : i32
    scf.if %2 {
      %c0_16 = arith.constant 0 : index
      %c0_17 = arith.constant 0 : index
      %24 = vector.load %arg1[%c0_16, %c0_17] : memref<128x128xbf16, #tpu.memory_space<vmem>>, vector<128x128xbf16>
      %c0_18 = arith.constant 0 : index
      %c0_19 = arith.constant 0 : index
      %25 = vector.load %arg2[%c0_18, %c0_19] : memref<128x1xbf16, #tpu.memory_space<vmem>>, vector<128x1xbf16>
      %cst_20 = arith.constant dense<0.000000e+00> : vector<128x1xf32>
      %26 = tpu.matmul %24, %25, %cst_20 {dimension_numbers = #tpu.dot_dimension_numbers<[1], [0], [0], [1], [0, 0, 1, 1], [], []>} : vector<128x128xbf16>, vector<128x1xbf16>, vector<128x1xf32> -> vector<128x1xf32>
      %c0_21 = arith.constant 0 : index
      %c0_22 = arith.constant 0 : index
      %27 = vector.load %arg3[%c0_21, %c0_22] : memref<1x128xf32, #tpu.memory_space<vmem>>, vector<1x128xf32>
      %28 = vector.broadcast %26 : vector<128x1xf32> to vector<128x128xf32>
      %29 = vector.broadcast %27 : vector<1x128xf32> to vector<128x128xf32>
      %30 = arith.mulf %28, %29 : vector<128x128xf32>
      %c0_23 = arith.constant 0 : index
      %c0_24 = arith.constant 0 : index
      %31 = vector.load %arg4[%c0_23, %c0_24] : memref<1x128xf32, #tpu.memory_space<vmem>>, vector<1x128xf32>
      %32 = vector.broadcast %31 : vector<1x128xf32> to vector<128x128xf32>
      %33 = arith.addf %30, %32 : vector<128x128xf32>
      %cst_25 = arith.constant 0.000000e+00 : f32
      %34 = vector.broadcast %cst_25 : f32 to vector<128x128xf32>
      %35 = arith.maximumf %33, %34 : vector<128x128xf32>
      %36 = arith.truncf %35 : vector<128x128xf32> to vector<128x128xbf16>
      %c0_26 = arith.constant 0 : index
      %c0_27 = arith.constant 0 : index
      %37 = vector.load %arg10[%c0_26, %c0_27] : memref<128x128xbf16, #tpu.memory_space<vmem>>, vector<128x128xbf16>
      tpu.vector_store %arg10[%c0_26, %c0_27], %36 {strides = array<i32>} : memref<128x128xbf16, #tpu.memory_space<vmem>>, vector<128x128xbf16>,
    } else {
    }
    %c128_i32 = arith.constant 128 : i32
    %3 = arith.muli %arg0, %c128_i32 : i32
    %4 = tpu.assume_multiple %3, 128 : i32
    %5 = arith.index_cast %4 : i32 to index
    %c0 = arith.constant 0 : index
    %6 = vector.load %arg1[%5, %c0] : memref<128x128xbf16, #tpu.memory_space<vmem>>, vector<128x128xbf16>
    %c0_1 = arith.constant 0 : index
    %c0_2 = arith.constant 0 : index
    %7 = vector.load %arg10[%c0_1, %c0_2] : memref<128x128xbf16, #tpu.memory_space<vmem>>, vector<128x128xbf16>
    %cst = arith.constant dense<0.000000e+00> : vector<128x128xf32>
    %8 = tpu.matmul %6, %7, %cst {dimension_numbers = #tpu.dot_dimension_numbers<[1], [0], [0], [1], [0, 0, 1, 1], [], []>} : vector<128x128xbf16>, vector<128x128xbf16>, vector<128x128xf32> -> vector<128x128xf32>
    %9 = arith.truncf %8 : vector<128x128xf32> to vector<128x128xbf16>
    %c0_3 = arith.constant 0 : index
    %c0_4 = arith.constant 0 : index
    %10 = vector.load %arg5[%c0_3, %c0_4] : memref<128x128xbf16, #tpu.memory_space<vmem>>, vector<128x128xbf16>
    %cst_5 = arith.constant dense<0.000000e+00> : vector<128x128xf32>
    %11 = tpu.matmul %9, %10, %cst_5 {dimension_numbers = #tpu.dot_dimension_numbers<[1], [0], [0], [1], [0, 0, 1, 1], [], []>} : vector<128x128xbf16>, vector<128x128xbf16>, vector<128x128xf32> -> vector<128x128xf32>
    %c0_6 = arith.constant 0 : index
    %c0_7 = arith.constant 0 : index
    %12 = vector.load %arg6[%c0_6, %c0_7] : memref<1x128xf32, #tpu.memory_space<vmem>>, vector<1x128xf32>
    %13 = vector.broadcast %12 : vector<1x128xf32> to vector<128x128xf32>
    %14 = arith.addf %11, %13 : vector<128x128xf32>
    %cst_8 = arith.constant 0.000000e+00 : f32
    %15 = vector.broadcast %cst_8 : f32 to vector<128x128xf32>
    %16 = arith.maximumf %14, %15 : vector<128x128xf32>
    %17 = arith.truncf %16 : vector<128x128xf32> to vector<128x128xbf16>
    %c0_9 = arith.constant 0 : index
    %c0_10 = arith.constant 0 : index
    %18 = vector.load %arg7[%c0_9, %c0_10] : memref<128x128xbf16, #tpu.memory_space<vmem>>, vector<128x128xbf16>
    %cst_11 = arith.constant dense<0.000000e+00> : vector<128x128xf32>
    %19 = tpu.matmul %17, %18, %cst_11 {dimension_numbers = #tpu.dot_dimension_numbers<[1], [0], [0], [1], [0, 0, 1, 1], [], []>} : vector<128x128xbf16>, vector<128x128xbf16>, vector<128x128xf32> -> vector<128x128xf32>
    %c0_12 = arith.constant 0 : index
    %c0_13 = arith.constant 0 : index
    %20 = vector.load %arg8[%c0_12, %c0_13] : memref<1x128xf32, #tpu.memory_space<vmem>>, vector<1x128xf32>
    %21 = vector.broadcast %20 : vector<1x128xf32> to vector<128x128xf32>
    %22 = arith.addf %19, %21 : vector<128x128xf32>
    %c0_14 = arith.constant 0 : index
    %c0_15 = arith.constant 0 : index
    %23 = vector.load %arg9[%c0_14, %c0_15] : memref<128x128xf32, #tpu.memory_space<vmem>>, vector<128x128xf32>
    tpu.vector_store %arg9[%c0_14, %c0_15], %22 {strides = array<i32>} : memref<128x128xf32, #tpu.memory_space<vmem>>, vector<128x128xf32>,
    return
  }
  func.func @transform_0(%arg0: i32) -> (i32, i32) {
    %c0_i32 = arith.constant 0 : i32
    %c0_i32_0 = arith.constant 0 : i32
    %c0_i32_1 = arith.constant 0 : i32
    return %c0_i32, %c0_i32_0 : i32, i32
  }
  func.func @transform_1(%arg0: i32) -> (i32, i32) {
    %c0_i32 = arith.constant 0 : i32
    %c0_i32_0 = arith.constant 0 : i32
    %c0_i32_1 = arith.constant 0 : i32
    return %c0_i32, %c0_i32_0 : i32, i32
  }
  func.func @transform_2(%arg0: i32) -> (i32, i32) {
    %c0_i32 = arith.constant 0 : i32
    %c0_i32_0 = arith.constant 0 : i32
    %c0_i32_1 = arith.constant 0 : i32
    return %c0_i32, %c0_i32_0 : i32, i32
  }
  func.func @transform_3(%arg0: i32) -> (i32, i32) {
    %c0_i32 = arith.constant 0 : i32
    %c0_i32_0 = arith.constant 0 : i32
    %c0_i32_1 = arith.constant 0 : i32
    return %c0_i32, %c0_i32_0 : i32, i32
  }
  func.func @transform_4(%arg0: i32) -> (i32, i32) {
    %c0_i32 = arith.constant 0 : i32
    %c0_i32_0 = arith.constant 0 : i32
    %c0_i32_1 = arith.constant 0 : i32
    return %c0_i32, %c0_i32_0 : i32, i32
  }
  func.func @transform_5(%arg0: i32) -> (i32, i32) {
    %c0_i32 = arith.constant 0 : i32
    %c0_i32_0 = arith.constant 0 : i32
    %c0_i32_1 = arith.constant 0 : i32
    return %c0_i32, %c0_i32_0 : i32, i32
  }
  func.func @transform_6(%arg0: i32) -> (i32, i32) {
    %c0_i32 = arith.constant 0 : i32
    %c0_i32_0 = arith.constant 0 : i32
    %c0_i32_1 = arith.constant 0 : i32
    return %c0_i32, %c0_i32_0 : i32, i32
  }
  func.func @transform_7(%arg0: i32) -> (i32, i32) {
    %c0_i32 = arith.constant 0 : i32
    %c0_i32_0 = arith.constant 0 : i32
    %c0_i32_1 = arith.constant 0 : i32
    return %c0_i32, %c0_i32_0 : i32, i32
  }
  func.func @transform_8(%arg0: i32) -> (i32, i32) {
    %c0_i32 = arith.constant 0 : i32
    %c0_i32_0 = arith.constant 0 : i32
    return %arg0, %c0_i32 : i32, i32
  }
}

</mosaic_0001>

<bundles_post_ra>
// kernel: tpu_custom_call.1
= control target key start
LH: loop header
LB: loop body
LE: loop exit
PB: predicated region body
PF: predicated region fallthrough
CT: control target
= control target key end

     0   :  { %13 = vsyncpa [#allocation4], 0  ;;  %s1591_s0 = inlined_call_operand.vmem [shape: bf16[128,128], index: 0, kind: input, shape index: {}]   ;;  %s1592_s1 = inlined_call_operand.vmem [shape: bf16[128,1], index: 1, kind: input, shape index: {}]   ;;  %s1593_s2 = inlined_call_operand.vmem [shape: f32[1,128], index: 2, kind: input, shape index: {}]   ;;  %s1594_s3 = inlined_call_operand.vmem [shape: f32[1,128], index: 3, kind: input, shape index: {}]   ;;  %s1595_s4 = inlined_call_operand.hbm [shape: bf16[128,128], index: 4, kind: input, shape index: {}]   ;;  %s1596_s5 = inlined_call_operand.vmem [shape: f32[1,128], index: 5, kind: input, shape index: {}]   ;;  %s1597_s6 = inlined_call_operand.hbm [shape: bf16[128,128], index: 6, kind: input, shape index: {}]   ;;  %s1598_s7 = inlined_call_operand.vmem [shape: f32[1,128], index: 7, kind: input, shape index: {}]   ;;  %s1599_s8 = inlined_call_operand.hbm [shape: f32[128,128], index: 8, kind: output, shape index: {}]  }
   0x1   :  { %14 = vsyncpa [#allocation7], 0 }
   0x2   :  { %15 = vsyncpa [#allocation5], 0  ;;  %s1382_s27 = smov [#allocation3]   ;;  %s1310_s9 = scalar_lea.hbm %s1595_s4, 1024 }
   0x3   :  { %s29_s28 = sshll.u32 %s1382_s27, 4  ;;  %p1311_p0 = scmp.ne.s32.totalorder %s1595_s4, %s1310_s9  ;;  %s30_s28 = int_to_ptr.vmem [resolvable:$true] %s29_s28 }
   0x4   :  { %p1314_p1 = scmp.lt.u32.totalorder %s1310_s9, %s1595_s4 }
   0x6   :  { %p1316_p2 = pnand %p1314_p1, %p1311_p0 }
   0x8   :  { %1319 = shalt.err (!%p1316_p2)
}
   0x9   :  { %s1320_s14 = scalar_lea.vmem %s30_s28, 1024  ;;  %p1325_p4 = scmp.lt.s32.totalorder %s30_s28, %s30_s28 }
   0xa   :  { %p1321_p3 = scmp.ne.s32.totalorder %s30_s28, %s1320_s14  ;;  %p1326_p5 = scmp.lt.s32.totalorder %s1320_s14, %s1320_s14 }
   0xc   :  { %p1327_p6 = por %p1326_p5, %p1325_p4 }
   0xe   :  { %p1328_p7 = pnand %p1327_p6, %p1321_p3 }
  0x10   :  { %1331 = shalt.err (!%p1328_p7)
}
  0x11   :  { %s1383_s15 = smov 64   ;;  %s1384_s16 = smov 4  }
  0x12   :  { %35 = dma.hbm_to_vmem [thread:$0]  %s1595_s4, 1024, %s30_s28, [#allocation4], %s1383_s15, %s1383_s15, %s1384_s16  }
  0x13   :  { %s1385_s19 = smov [#allocation6]   ;;  %s1332_s23 = scalar_lea.hbm %s1597_s6, 1024 }
  0x14   :  { %s43_s20 = sshll.u32 %s1385_s19, 4  ;;  %p1333_p8 = scmp.ne.s32.totalorder %s1597_s6, %s1332_s23  ;;  %s44_s20 = int_to_ptr.vmem [resolvable:$true] %s43_s20 }
  0x15   :  { %p1336_p9 = scmp.lt.u32.totalorder %s1332_s23, %s1597_s6 }
  0x17   :  { %p1338_p10 = pnand %p1336_p9, %p1333_p8 }
  0x19   :  { %1341 = shalt.err (!%p1338_p10)
}
  0x1a   :  { %s1342_s29 = scalar_lea.vmem %s44_s20, 1024  ;;  %p1347_p12 = scmp.lt.s32.totalorder %s44_s20, %s44_s20 }
  0x1b   :  { %p1343_p11 = scmp.ne.s32.totalorder %s44_s20, %s1342_s29  ;;  %p1348_p13 = scmp.lt.s32.totalorder %s1342_s29, %s1342_s29 }
  0x1d   :  { %p1349_p0 = por %p1348_p13, %p1347_p12 }
  0x1f   :  { %p1350_p1 = pnand %p1349_p0, %p1343_p11 }
  0x21   :  { %1353 = shalt.err (!%p1350_p1)
}
  0x22   :  { %49 = dma.hbm_to_vmem [thread:$0]  %s1597_s6, 1024, %s44_s20, [#allocation7], %s1383_s15, %s1383_s15, %s1384_s16  }
  0x23   :  { %1376 = dma.done.wait [#allocation4], 1024  }
  0x24   :  { %1377 = vsyncadd [#allocation4], 4294966272 }
  0x25   :  { %1378 = dma.done.wait [#allocation7], 1024  }
  0x26   :  { %1379 = vsyncadd [#allocation7], 4294966272  ;;  %v1386_v0 = vmov 0   ;;  %v1270_v1 = vld [vmem:[%s1592_s1] sm:$0xff]   ;;  %v1271_v2 = vld [vmem:[%s1592_s1 + $0x8] sm:$0xff]  }
  0x27   :  { %1269 = vset.pattern.permute.xlu1 %v1386_v0  ;;  %1268 = vset.pattern.permute.xlu0 %v1386_v0  ;;  %v1272_v3 = vld [vmem:[%s1592_s1 + $0x10] sm:$0xff]   ;;  %v1273_v4 = vld [vmem:[%s1592_s1 + $0x18] sm:$0xff]   ;;  %v1278_v5 = vld [vmem:[%s1591_s0] sm:$0xff]  }
  0x28   :  { %1132 = vmatprep.subr.bf16.mxu0 %v1270_v1  ;;  %1148 = vmatprep.mubr.bf16.mxu0 %v1278_v5  ;;  %v1274_v6 = vld [vmem:[%s1592_s1 + $0x20] sm:$0xff]   ;;  %v1275_v7 = vld [vmem:[%s1592_s1 + $0x28] sm:$0xff]   ;;  %v1276_v8 = vld [vmem:[%s1592_s1 + $0x30] sm:$0xff]  }
  0x29   :  { %1133 = vmatpush3.bf16.msra.mxu0 %v1270_v1  ;;  %v1277_v9 = vld [vmem:[%s1592_s1 + $0x38] sm:$0xff]   ;;  %v1279_v10 = vld [vmem:[%s1591_s0 + $0x8] sm:$0xff]   ;;  %v1280_v11 = vld [vmem:[%s1591_s0 + $0x10] sm:$0xff]  }
  0x2a   :  { %1134 = vmatprep.subr.bf16.mxu0 %v1271_v2  ;;  %v1281_v12 = vld [vmem:[%s1591_s0 + $0x18] sm:$0xff]   ;;  %v1282_v13 = vld [vmem:[%s1591_s0 + $0x20] sm:$0xff]   ;;  %v1283_v14 = vld [vmem:[%s1591_s0 + $0x28] sm:$0xff]  }
  0x2b   :  { %v1284_v15 = vld [vmem:[%s1591_s0 + $0x30] sm:$0xff]   ;;  %v1285_v16 = vld [vmem:[%s1591_s0 + $0x38] sm:$0xff]   ;;  %v1286_v33 = vld [vmem:[%s1591_s0] sm:$0xff]  }
  0x2c   :  { %1180 = vmatprep.mubr.bf16.mxu1 %v1286_v33  ;;  %v1294_v34 = vld [vmem:[#allocation3] sm:$0xff]   ;;  %v1295_v35 = vld [vmem:[#allocation3 + $0x8] sm:$0xff]   ;;  %v1296_v36 = vld [vmem:[#allocation3 + $0x10] sm:$0xff]  }
  0x2d   :  { %1135 = vmatpush3.bf16.msra.mxu0 %v1271_v2  ;;  %v1297_v37 = vld [vmem:[#allocation3 + $0x18] sm:$0xff]   ;;  %v1298_v38 = vld [vmem:[#allocation3 + $0x20] sm:$0xff]   ;;  %v1299_v39 = vld [vmem:[#allocation3 + $0x28] sm:$0xff]  }
  0x2e   :  { %1136 = vmatprep.subr.bf16.mxu0 %v1272_v3  ;;  %v1300_v40 = vld [vmem:[#allocation3 + $0x30] sm:$0xff]   ;;  %v1513_v41 = vld [vmem:[%s1593_s2] ss:$0 sm:$0xff] }
  0x2f   :  { %v1519_v45 = vld [vmem:[%s1594_s3] ss:$0 sm:$0xff] }
  0x31   :  { %1137 = vmatpush3.bf16.msra.mxu0 %v1272_v3 }
  0x32   :  { %1138 = vmatprep.subr.bf16.mxu0 %v1273_v4 }
  0x35   :  { %1139 = vmatpush3.bf16.msra.mxu0 %v1273_v4 }
  0x36   :  { %1140 = vmatprep.subr.bf16.mxu0 %v1274_v6 }
  0x39   :  { %1141 = vmatpush3.bf16.msra.mxu0 %v1274_v6 }
  0x3a   :  { %1142 = vmatprep.subr.bf16.mxu0 %v1275_v7 }
  0x3d   :  { %1143 = vmatpush3.bf16.msra.mxu0 %v1275_v7 }
  0x3e   :  { %1144 = vmatprep.subr.bf16.mxu0 %v1276_v8 }
  0x41   :  { %1145 = vmatpush3.bf16.msra.mxu0 %v1276_v8 }
  0x42   :  { %1146 = vmatprep.subr.bf16.mxu0 %v1277_v9 }
  0x45   :  { %1147 = vmatpush3.bf16.msra.mxu0 %v1277_v9 }
  0x46   :  { %1196 = vmatprep.subr.bf16.mxu0 %v1294_v34 }
  0x48   :  { %1149 = vmatmul.mubr.bf16.vlgmr.msra.gmra.mrb[0].mxu0 %v1279_v10 }
  0x49   :  { %1152 = vmatprep.mubr.bf16.mxu0 %v1280_v11  ;;  %1197 = vmatpush3.bf16.msra.mxu0 %v1294_v34 }
  0x4a   :  { %1198 = vmatprep.subr.bf16.mxu0 %v1295_v35 }
  0x4d   :  { %1199 = vmatpush3.bf16.msra.mxu0 %v1295_v35 }
  0x4e   :  { %1200 = vmatprep.subr.bf16.mxu0 %v1296_v36 }
  0x50   :  { %1153 = vmatmul.mubr.bf16.gmra.mrb[4].mxu0 %v1281_v12 }
  0x51   :  { %1156 = vmatprep.mubr.bf16.mxu0 %v1282_v13  ;;  %1201 = vmatpush3.bf16.msra.mxu0 %v1296_v36 }
  0x52   :  { %1202 = vmatprep.subr.bf16.mxu0 %v1297_v37 }
  0x55   :  { %1203 = vmatpush3.bf16.msra.mxu0 %v1297_v37 }
  0x56   :  { %1204 = vmatprep.subr.bf16.mxu0 %v1298_v38 }
  0x58   :  { %1157 = vmatmul.mubr.bf16.gmra.mrb[8].mxu0 %v1283_v14 }
  0x59   :  { %1160 = vmatprep.mubr.bf16.mxu0 %v1284_v15  ;;  %1205 = vmatpush3.bf16.msra.mxu0 %v1298_v38 }
  0x5a   :  { %1206 = vmatprep.subr.bf16.mxu0 %v1299_v39 }
  0x5d   :  { %1207 = vmatpush3.bf16.msra.mxu0 %v1299_v39 }
  0x5e   :  { %1208 = vmatprep.subr.bf16.mxu0 %v1300_v40 }
  0x60   :  { %1161 = vmatmul.mubr.bf16.gmra.mrb[12].mxu0 %v1285_v16 }
  0x61   :  { %1209 = vmatpush3.bf16.msra.mxu0 %v1300_v40 }
 0x11b   :  { %v1150_v17 = vpop.f32.mrb[0].mxu0 }
 0x11c   :  { %301 = vperm.xlu1 %1269, %v1150_v17   ;;  %v225_v18 = vpop.f32.mrb[1].mxu0 }
 0x11d   :  { %291 = vperm.xlu0 %1268, %v225_v18   ;;  %v1151_v19 = vpop.f32.mrb[2].mxu0 }
 0x11e   :  { %v228_v20 = vpop.f32.mrb[3].mxu0 }
 0x120   :  { %306 = vperm.xlu1 %1269, %v1151_v19  }
 0x121   :  { %296 = vperm.xlu0 %1268, %v228_v20  }
 0x123   :  { %v1154_v21 = vpop.f32.mrb[4].mxu0 }
 0x124   :  { %v241_v22 = vpop.f32.mrb[5].mxu0 }
 0x125   :  { %311 = vperm.xlu0 %1268, %v241_v22   ;;  %v1155_v23 = vpop.f32.mrb[6].mxu0 }
 0x126   :  { %v244_v24 = vpop.f32.mrb[7].mxu0 }
 0x127   :  { %316 = vperm.xlu1 %1269, %v244_v24  }
 0x129   :  { %321 = vperm.xlu0 %1268, %v1154_v21  }
 0x12b   :  { %326 = vperm.xlu1 %1269, %v1155_v23   ;;  %v1158_v25 = vpop.f32.mrb[8].mxu0 }
 0x12c   :  { %v257_v26 = vpop.f32.mrb[9].mxu0 }
 0x12d   :  { %331 = vperm.xlu0 %1268, %v257_v26   ;;  %v1159_v27 = vpop.f32.mrb[10].mxu0 }
 0x12e   :  { %v260_v28 = vpop.f32.mrb[11].mxu0 }
 0x12f   :  { %336 = vperm.xlu1 %1269, %v260_v28  }
 0x131   :  { %341 = vperm.xlu0 %1268, %v1158_v25  }
 0x133   :  { %346 = vperm.xlu1 %1269, %v1159_v27   ;;  %v1162_v29 = vpop.f32.mrb[12].mxu0 }
 0x134   :  { %v273_v30 = vpop.f32.mrb[13].mxu0 }
 0x135   :  { %351 = vperm.xlu0 %1268, %v273_v30   ;;  %v1163_v31 = vpop.f32.mrb[14].mxu0 }
 0x136   :  { %v276_v32 = vpop.f32.mrb[15].mxu0 }
 0x137   :  { %356 = vperm.xlu1 %1269, %v276_v32  }
 0x139   :  { %361 = vperm.xlu0 %1268, %v1162_v29  }
 0x13b   :  { %366 = vperm.xlu1 %1269, %v1163_v31  }
 0x19b   :  { %v302_v42 = vpop.permute.xlu1 %301 }
 0x19c   :  { %v292_v43 = vpop.permute.xlu0 %291  ;;  %v377_v46 = vmul.f32 %v1513_v41, %v302_v42 }
 0x19d   :  { %v375_v44 = vmul.f32 %v1513_v41, %v292_v43 }
 0x19e   :  { %v400_v53 = vadd.f32 %v1519_v45, %v377_v46 }
 0x19f   :  { %v307_v47 = vpop.permute.xlu1 %306  ;;  %v398_v50 = vadd.f32 %v1519_v45, %v375_v44 }
 0x1a0   :  { %v378_v48 = vmul.f32 %v1513_v41, %v307_v47  ;;  %v297_v49 = vpop.permute.xlu0 %296  ;;  %v416_v61 = vmax.f32 %v400_v53, 0.0  ;;  %v1287_v53 = vld [vmem:[%s1591_s0 + $0x8] sm:$0xff]  }
 0x1a1   :  { %v376_v51 = vmul.f32 %v1513_v41, %v297_v49  ;;  %v414_v56 = vmax.f32 %v398_v50, 0.0 }
 0x1a2   :  { %v401_v52 = vadd.f32 %v1519_v45, %v378_v48 }
 0x1a3   :  { %v399_v54 = vadd.f32 %v1519_v45, %v376_v51 }
 0x1a4   :  { %v312_v55 = vpop.permute.xlu0 %311  ;;  %v417_v57 = vmax.f32 %v401_v52, 0.0 }
 0x1a5   :  { %v415_v58 = vmax.f32 %v399_v54, 0.0  ;;  %v379_v59 = vmul.f32 %v1513_v41, %v312_v55  ;;  %v1290_v54 = vld [vmem:[%s1591_s0 + $0x20] sm:$0xff]   ;;  %v1291_v55 = vld [vmem:[%s1591_s0 + $0x28] sm:$0xff]  }
 0x1a6   :  { %v317_v60 = vpop.permute.xlu1 %316  ;;  %v431_v4 = vpack.c.bf16 %v417_v57, %v416_v61  ;;  %v1293_v57 = vld [vmem:[%s1591_s0 + $0x38] sm:$0xff]   ;;  %v1304_v61 = vld [vmem:[#allocation6 + $0x10] sm:$0xff]  }
 0x1a7   :  { %v402_v62 = vadd.f32 %v1519_v45, %v379_v59  ;;  %v380_v63 = vmul.f32 %v1513_v41, %v317_v60  ;;  %v430_v0 = vpack.c.bf16 %v415_v58, %v414_v56  ;;  %v1292_v56 = vld [vmem:[%s1591_s0 + $0x30] sm:$0xff]   ;;  %v1301_v58 = vld [vmem:[#allocation3 + $0x38] sm:$0xff]   ;;  %v1302_v59 = vld [vmem:[#allocation6] sm:$0xff]  }
 0x1a8   :  { %v322_v1 = vpop.permute.xlu0 %321  ;;  %1210 = vmatprep.subr.bf16.mxu0 %v1301_v58  ;;  %v1303_v60 = vld [vmem:[#allocation6 + $0x8] sm:$0xff]  }
 0x1a9   :  { %v403_v2 = vadd.f32 %v1519_v45, %v380_v63  ;;  %v381_v3 = vmul.f32 %v1513_v41, %v322_v1  ;;  %1164 = vmatprep.subr.bf16.mxu1 %v430_v0  ;;  %v418_v6 = vmax.f32 %v402_v62, 0.0  ;;  %1211 = vmatpush3.bf16.msra.mxu0 %v1301_v58  ;;  %v1305_v62 = vld [vmem:[#allocation6 + $0x18] sm:$0xff]   ;;  %v1306_v63 = vld [vmem:[#allocation6 + $0x20] sm:$0xff]  }
 0x1aa   :  { %1165 = vmatpush3.bf16.msra.mxu1 %v430_v0  ;;  %v327_v5 = vpop.permute.xlu1 %326  ;;  %v1307_v0 = vld [vmem:[#allocation6 + $0x28] sm:$0xff]  }
 0x1ab   :  { %v419_v7 = vmax.f32 %v403_v2, 0.0  ;;  %v404_v8 = vadd.f32 %v1519_v45, %v381_v3  ;;  %v382_v9 = vmul.f32 %v1513_v41, %v327_v5  ;;  %1166 = vmatprep.subr.bf16.mxu1 %v431_v4 }
 0x1ac   :  { %v332_v10 = vpop.permute.xlu0 %331 }
 0x1ad   :  { %v405_v11 = vadd.f32 %v1519_v45, %v382_v9  ;;  %v383_v12 = vmul.f32 %v1513_v41, %v332_v10  ;;  %v432_v13 = vpack.c.bf16 %v419_v7, %v418_v6  ;;  %v420_v15 = vmax.f32 %v404_v8, 0.0 }
 0x1ae   :  { %1167 = vmatpush3.bf16.msra.mxu1 %v431_v4  ;;  %v337_v14 = vpop.permute.xlu1 %336 }
 0x1af   :  { %v421_v16 = vmax.f32 %v405_v11, 0.0  ;;  %v406_v17 = vadd.f32 %v1519_v45, %v383_v12  ;;  %v384_v18 = vmul.f32 %v1513_v41, %v337_v14  ;;  %1168 = vmatprep.subr.bf16.mxu1 %v432_v13 }
 0x1b0   :  { %v342_v19 = vpop.permute.xlu0 %341 }
 0x1b1   :  { %v407_v20 = vadd.f32 %v1519_v45, %v384_v18  ;;  %v385_v21 = vmul.f32 %v1513_v41, %v342_v19  ;;  %v433_v22 = vpack.c.bf16 %v421_v16, %v420_v15  ;;  %v422_v24 = vmax.f32 %v406_v17, 0.0 }
 0x1b2   :  { %1169 = vmatpush3.bf16.msra.mxu1 %v432_v13  ;;  %v347_v23 = vpop.permute.xlu1 %346 }
 0x1b3   :  { %v423_v25 = vmax.f32 %v407_v20, 0.0  ;;  %v408_v26 = vadd.f32 %v1519_v45, %v385_v21  ;;  %v386_v27 = vmul.f32 %v1513_v41, %v347_v23  ;;  %1170 = vmatprep.subr.bf16.mxu1 %v433_v22 }
 0x1b4   :  { %v352_v28 = vpop.permute.xlu0 %351 }
 0x1b5   :  { %v409_v29 = vadd.f32 %v1519_v45, %v386_v27  ;;  %v387_v30 = vmul.f32 %v1513_v41, %v352_v28  ;;  %v434_v31 = vpack.c.bf16 %v423_v25, %v422_v24  ;;  %v424_v33 = vmax.f32 %v408_v26, 0.0  ;;  %v1308_v25 = vld [vmem:[#allocation6 + $0x30] sm:$0xff]   ;;  %v1309_v26 = vld [vmem:[#allocation6 + $0x38] sm:$0xff]   ;;  %v1050_v27 = vld [vmem:[%s1596_s5] ss:$0 sm:$0xff] }
 0x1b6   :  { %1171 = vmatpush3.bf16.msra.mxu1 %v433_v22  ;;  %v357_v32 = vpop.permute.xlu1 %356 }
 0x1b7   :  { %v425_v34 = vmax.f32 %v409_v29, 0.0  ;;  %v410_v35 = vadd.f32 %v1519_v45, %v387_v30  ;;  %v388_v36 = vmul.f32 %v1513_v41, %v357_v32  ;;  %1172 = vmatprep.subr.bf16.mxu1 %v434_v31 }
 0x1b8   :  { %v362_v37 = vpop.permute.xlu0 %361 }
 0x1b9   :  { %v411_v38 = vadd.f32 %v1519_v45, %v388_v36  ;;  %v389_v39 = vmul.f32 %v1513_v41, %v362_v37  ;;  %v435_v40 = vpack.c.bf16 %v425_v34, %v424_v33  ;;  %v426_v43 = vmax.f32 %v410_v35, 0.0 }
 0x1ba   :  { %1173 = vmatpush3.bf16.msra.mxu1 %v434_v31  ;;  %v367_v42 = vpop.permute.xlu1 %366 }
 0x1bb   :  { %v427_v44 = vmax.f32 %v411_v38, 0.0  ;;  %v412_v46 = vadd.f32 %v1519_v45, %v389_v39  ;;  %v390_v47 = vmul.f32 %v1513_v41, %v367_v42  ;;  %1174 = vmatprep.subr.bf16.mxu1 %v435_v40  ;;  %v1288_v41 = vld [vmem:[%s1591_s0 + $0x10] sm:$0xff]  }
 0x1bd   :  { %v413_v48 = vadd.f32 %v1519_v45, %v390_v47  ;;  %v436_v49 = vpack.c.bf16 %v427_v44, %v426_v43  ;;  %v428_v50 = vmax.f32 %v412_v46, 0.0  ;;  %v1289_v45 = vld [vmem:[%s1591_s0 + $0x18] sm:$0xff]  }
 0x1be   :  { %1175 = vmatpush3.bf16.msra.mxu1 %v435_v40 }
 0x1bf   :  { %v429_v51 = vmax.f32 %v413_v48, 0.0  ;;  %1176 = vmatprep.subr.bf16.mxu1 %v436_v49 }
 0x1c1   :  { %v437_v52 = vpack.c.bf16 %v429_v51, %v428_v50 }
 0x1c2   :  { %1177 = vmatpush3.bf16.msra.mxu1 %v436_v49 }
 0x1c3   :  { %1178 = vmatprep.subr.bf16.mxu1 %v437_v52 }
 0x1c6   :  { %1179 = vmatpush3.bf16.msra.mxu1 %v437_v52 }
 0x1c7   :  { %1228 = vmatprep.subr.bf16.mxu1 %v1302_v59 }
 0x1c9   :  { %1181 = vmatmul.mubr.bf16.vlgmr.msra.gmra.mrb[0].mxu1 %v1287_v53 }
 0x1ca   :  { %1184 = vmatprep.mubr.bf16.mxu1 %v1288_v41  ;;  %1229 = vmatpush3.bf16.msra.mxu1 %v1302_v59 }
 0x1cb   :  { %1230 = vmatprep.subr.bf16.mxu1 %v1303_v60 }
 0x1ce   :  { %1231 = vmatpush3.bf16.msra.mxu1 %v1303_v60 }
 0x1cf   :  { %1232 = vmatprep.subr.bf16.mxu1 %v1304_v61 }
 0x1d1   :  { %1185 = vmatmul.mubr.bf16.gmra.mrb[4].mxu1 %v1289_v45 }
 0x1d2   :  { %1188 = vmatprep.mubr.bf16.mxu1 %v1290_v54  ;;  %1233 = vmatpush3.bf16.msra.mxu1 %v1304_v61 }
 0x1d3   :  { %1234 = vmatprep.subr.bf16.mxu1 %v1305_v62 }
 0x1d6   :  { %1235 = vmatpush3.bf16.msra.mxu1 %v1305_v62 }
 0x1d7   :  { %1236 = vmatprep.subr.bf16.mxu1 %v1306_v63 }
 0x1d9   :  { %1189 = vmatmul.mubr.bf16.gmra.mrb[8].mxu1 %v1291_v55 }
 0x1da   :  { %1192 = vmatprep.mubr.bf16.mxu1 %v1292_v56  ;;  %1237 = vmatpush3.bf16.msra.mxu1 %v1306_v63 }
 0x1db   :  { %1238 = vmatprep.subr.bf16.mxu1 %v1307_v0 }
 0x1de   :  { %1239 = vmatpush3.bf16.msra.mxu1 %v1307_v0 }
 0x1df   :  { %1240 = vmatprep.subr.bf16.mxu1 %v1308_v25 }
 0x1e1   :  { %1193 = vmatmul.mubr.bf16.gmra.mrb[12].mxu1 %v1293_v57 }
 0x1e2   :  { %1241 = vmatpush3.bf16.msra.mxu1 %v1308_v25 }
 0x1e3   :  { %1242 = vmatprep.subr.bf16.mxu1 %v1309_v26 }
 0x1e6   :  { %1243 = vmatpush3.bf16.msra.mxu1 %v1309_v26 }
 0x29c   :  { %v1182_v1 = vpop.f32.mrb[0].mxu1 }
 0x29d   :  { %v557_v2 = vpop.f32.mrb[1].mxu1 }
 0x29e   :  { %v1183_v3 = vpop.f32.mrb[2].mxu1 }
 0x29f   :  { %v621_v4 = vpack.c.bf16 %v1183_v3, %v1182_v1  ;;  %v560_v5 = vpop.f32.mrb[3].mxu1 }
 0x2a0   :  { %v620_v6 = vpack.c.bf16 %v560_v5, %v557_v2 }
 0x2a2   :  { %1212 = vmatprep.mubr.bf16.mxu0 %v620_v6 }
 0x2a3   :  { %1213 = vmatmul.mubr.bf16.vlgmr.msra.gmra.mrb[16].mxu0 %v621_v4 }
 0x2a4   :  { %v1186_v7 = vpop.f32.mrb[4].mxu1 }
 0x2a5   :  { %v573_v8 = vpop.f32.mrb[5].mxu1 }
 0x2a6   :  { %v1187_v9 = vpop.f32.mrb[6].mxu1 }
 0x2a7   :  { %v623_v10 = vpack.c.bf16 %v1187_v9, %v1186_v7  ;;  %v576_v11 = vpop.f32.mrb[7].mxu1 }
 0x2a8   :  { %v622_v12 = vpack.c.bf16 %v576_v11, %v573_v8 }
 0x2aa   :  { %1216 = vmatprep.mubr.bf16.mxu0 %v622_v12 }
 0x2ab   :  { %1217 = vmatmul.mubr.bf16.gmra.mrb[20].mxu0 %v623_v10 }
 0x2ac   :  { %v1190_v13 = vpop.f32.mrb[8].mxu1 }
 0x2ad   :  { %v589_v14 = vpop.f32.mrb[9].mxu1 }
 0x2ae   :  { %v1191_v15 = vpop.f32.mrb[10].mxu1 }
 0x2af   :  { %v625_v16 = vpack.c.bf16 %v1191_v15, %v1190_v13  ;;  %v592_v17 = vpop.f32.mrb[11].mxu1 }
 0x2b0   :  { %v624_v18 = vpack.c.bf16 %v592_v17, %v589_v14 }
 0x2b2   :  { %1220 = vmatprep.mubr.bf16.mxu0 %v624_v18 }
 0x2b3   :  { %1221 = vmatmul.mubr.bf16.gmra.mrb[24].mxu0 %v625_v16 }
 0x2b4   :  { %v1194_v19 = vpop.f32.mrb[12].mxu1 }
 0x2b5   :  { %v605_v20 = vpop.f32.mrb[13].mxu1 }
 0x2b6   :  { %v1195_v21 = vpop.f32.mrb[14].mxu1 }
 0x2b7   :  { %v627_v22 = vpack.c.bf16 %v1195_v21, %v1194_v19  ;;  %v608_v23 = vpop.f32.mrb[15].mxu1 }
 0x2b8   :  { %v626_v24 = vpack.c.bf16 %v608_v23, %v605_v20  ;;  %v1059_v20 = vld [vmem:[%s1598_s7] ss:$0 sm:$0xff]  ;;  %s1387_s7 = smov [#allocation8]  }
 0x2b9   :  { %s1009_s10 = sshll.u32 %s1387_s7, 4  ;;  %s1010_s10 = int_to_ptr.vmem [resolvable:$true] %s1009_s10 }
 0x2ba   :  { %1224 = vmatprep.mubr.bf16.mxu0 %v626_v24  ;;  %s1354_s11 = scalar_lea.vmem %s1010_s10, 2048  ;;  %p1359_p3 = scmp.lt.s32.totalorder %s1010_s10, %s1010_s10 }
 0x2bb   :  { %1225 = vmatmul.mubr.bf16.gmra.mrb[28].mxu0 %v627_v22  ;;  %p1355_p2 = scmp.ne.s32.totalorder %s1010_s10, %s1354_s11  ;;  %p1360_p4 = scmp.lt.s32.totalorder %s1354_s11, %s1354_s11 }
 0x2bd   :  { %p1361_p5 = por %p1360_p4, %p1359_p3 }
 0x2bf   :  { %p1362_p6 = pnand %p1361_p5, %p1355_p2 }
 0x376   :  { %v1214_v28 = vpop.f32.mrb[16].mxu0 }
 0x377   :  { %v742_v29 = vadd.f32 %v1214_v28, %v1050_v27  ;;  %v733_v30 = vpop.f32.mrb[17].mxu0 }
 0x378   :  { %v734_v31 = vadd.f32 %v1050_v27, %v733_v30  ;;  %v1215_v32 = vpop.f32.mrb[18].mxu0 }
 0x379   :  { %v745_v33 = vadd.f32 %v1215_v32, %v1050_v27  ;;  %v736_v34 = vpop.f32.mrb[19].mxu0  ;;  %v798_v36 = vmax.f32 %v742_v29, 0.0 }
 0x37a   :  { %v737_v35 = vadd.f32 %v1050_v27, %v736_v34  ;;  %v796_v38 = vmax.f32 %v734_v31, 0.0 }
 0x37b   :  { %v799_v37 = vmax.f32 %v745_v33, 0.0 }
 0x37c   :  { %v797_v39 = vmax.f32 %v737_v35, 0.0 }
 0x37d   :  { %v813_v40 = vpack.c.bf16 %v799_v37, %v798_v36 }
 0x37e   :  { %v812_v42 = vpack.c.bf16 %v797_v39, %v796_v38  ;;  %v1218_v43 = vpop.f32.mrb[20].mxu0 }
 0x37f   :  { %v758_v44 = vadd.f32 %v1218_v43, %v1050_v27  ;;  %v749_v46 = vpop.f32.mrb[21].mxu0 }
 0x380   :  { %v750_v47 = vadd.f32 %v1050_v27, %v749_v46  ;;  %v1219_v48 = vpop.f32.mrb[22].mxu0  ;;  %1244 = vmatprep.mubr.bf16.mxu1 %v812_v42 }
 0x381   :  { %v761_v49 = vadd.f32 %v1219_v48, %v1050_v27  ;;  %v752_v50 = vpop.f32.mrb[23].mxu0  ;;  %1245 = vmatmul.mubr.bf16.vlgmr.msra.gmra.mrb[16].mxu1 %v813_v40  ;;  %v802_v52 = vmax.f32 %v758_v44, 0.0 }
 0x382   :  { %v753_v51 = vadd.f32 %v1050_v27, %v752_v50  ;;  %v800_v41 = vmax.f32 %v750_v47, 0.0 }
 0x383   :  { %v803_v53 = vmax.f32 %v761_v49, 0.0 }
 0x384   :  { %v801_v45 = vmax.f32 %v753_v51, 0.0 }
 0x385   :  { %v815_v54 = vpack.c.bf16 %v803_v53, %v802_v52 }
 0x386   :  { %v814_v55 = vpack.c.bf16 %v801_v45, %v800_v41  ;;  %v1222_v56 = vpop.f32.mrb[24].mxu0 }
 0x387   :  { %v774_v57 = vadd.f32 %v1222_v56, %v1050_v27  ;;  %v765_v58 = vpop.f32.mrb[25].mxu0 }
 0x388   :  { %v766_v59 = vadd.f32 %v1050_v27, %v765_v58  ;;  %v1223_v60 = vpop.f32.mrb[26].mxu0  ;;  %1248 = vmatprep.mubr.bf16.mxu1 %v814_v55 }
 0x389   :  { %v777_v61 = vadd.f32 %v1223_v60, %v1050_v27  ;;  %v768_v62 = vpop.f32.mrb[27].mxu0  ;;  %1249 = vmatmul.mubr.bf16.gmra.mrb[20].mxu1 %v815_v54  ;;  %v806_v0 = vmax.f32 %v774_v57, 0.0 }
 0x38a   :  { %v769_v63 = vadd.f32 %v1050_v27, %v768_v62  ;;  %v804_v2 = vmax.f32 %v766_v59, 0.0 }
 0x38b   :  { %v807_v1 = vmax.f32 %v777_v61, 0.0 }
 0x38c   :  { %v805_v3 = vmax.f32 %v769_v63, 0.0 }
 0x38d   :  { %v817_v4 = vpack.c.bf16 %v807_v1, %v806_v0 }
 0x38e   :  { %v816_v5 = vpack.c.bf16 %v805_v3, %v804_v2  ;;  %v1226_v6 = vpop.f32.mrb[28].mxu0 }
 0x38f   :  { %v790_v7 = vadd.f32 %v1226_v6, %v1050_v27  ;;  %v781_v8 = vpop.f32.mrb[29].mxu0 }
 0x390   :  { %v782_v9 = vadd.f32 %v1050_v27, %v781_v8  ;;  %v1227_v10 = vpop.f32.mrb[30].mxu0  ;;  %1252 = vmatprep.mubr.bf16.mxu1 %v816_v5 }
 0x391   :  { %v793_v11 = vadd.f32 %v1227_v10, %v1050_v27  ;;  %v784_v12 = vpop.f32.mrb[31].mxu0  ;;  %1253 = vmatmul.mubr.bf16.gmra.mrb[24].mxu1 %v817_v4  ;;  %v810_v14 = vmax.f32 %v790_v7, 0.0 }
 0x392   :  { %v785_v13 = vadd.f32 %v1050_v27, %v784_v12  ;;  %v808_v16 = vmax.f32 %v782_v9, 0.0 }
 0x393   :  { %v811_v15 = vmax.f32 %v793_v11, 0.0 }
 0x394   :  { %v809_v17 = vmax.f32 %v785_v13, 0.0 }
 0x395   :  { %v819_v18 = vpack.c.bf16 %v811_v15, %v810_v14 }
 0x396   :  { %v818_v19 = vpack.c.bf16 %v809_v17, %v808_v16 }
 0x398   :  { %1256 = vmatprep.mubr.bf16.mxu1 %v818_v19 }
 0x399   :  { %1257 = vmatmul.mubr.bf16.gmra.mrb[28].mxu1 %v819_v18 }
 0x454   :  { %v1246_v21 = vpop.f32.mrb[16].mxu1 }
 0x455   :  { %v934_v22 = vadd.f32 %v1246_v21, %v1059_v20  ;;  %v925_v23 = vpop.f32.mrb[17].mxu1 }
 0x456   :  { %v926_v24 = vadd.f32 %v1059_v20, %v925_v23  ;;  %v1247_v25 = vpop.f32.mrb[18].mxu1 }
 0x457   :  { %990 = vst [vmem:[#allocation8 + $0x10] sm:$0xff] %v934_v22  ;;  %v937_v26 = vadd.f32 %v1247_v25, %v1059_v20  ;;  %v928_v27 = vpop.f32.mrb[19].mxu1 }
 0x458   :  { %988 = vst [vmem:[#allocation8] sm:$0xff] %v926_v24  ;;  %v929_v28 = vadd.f32 %v1059_v20, %v928_v27 }
 0x459   :  { %991 = vst [vmem:[#allocation8 + $0x18] sm:$0xff] %v937_v26 }
 0x45a   :  { %989 = vst [vmem:[#allocation8 + $0x8] sm:$0xff] %v929_v28 }
 0x45c   :  { %v1250_v29 = vpop.f32.mrb[20].mxu1 }
 0x45d   :  { %v950_v30 = vadd.f32 %v1250_v29, %v1059_v20  ;;  %v941_v31 = vpop.f32.mrb[21].mxu1 }
 0x45e   :  { %v942_v32 = vadd.f32 %v1059_v20, %v941_v31  ;;  %v1251_v33 = vpop.f32.mrb[22].mxu1 }
 0x45f   :  { %994 = vst [vmem:[#allocation8 + $0x30] sm:$0xff] %v950_v30  ;;  %v953_v34 = vadd.f32 %v1251_v33, %v1059_v20  ;;  %v944_v35 = vpop.f32.mrb[23].mxu1 }
 0x460   :  { %992 = vst [vmem:[#allocation8 + $0x20] sm:$0xff] %v942_v32  ;;  %v945_v36 = vadd.f32 %v1059_v20, %v944_v35 }
 0x461   :  { %995 = vst [vmem:[#allocation8 + $0x38] sm:$0xff] %v953_v34 }
 0x462   :  { %993 = vst [vmem:[#allocation8 + $0x28] sm:$0xff] %v945_v36 }
 0x464   :  { %v1254_v37 = vpop.f32.mrb[24].mxu1 }
 0x465   :  { %v966_v38 = vadd.f32 %v1254_v37, %v1059_v20  ;;  %v957_v39 = vpop.f32.mrb[25].mxu1 }
 0x466   :  { %v958_v40 = vadd.f32 %v1059_v20, %v957_v39  ;;  %v1255_v42 = vpop.f32.mrb[26].mxu1 }
 0x467   :  { %998 = vst [vmem:[#allocation8 + $0x50] sm:$0xff] %v966_v38  ;;  %v969_v43 = vadd.f32 %v1255_v42, %v1059_v20  ;;  %v960_v44 = vpop.f32.mrb[27].mxu1 }
 0x468   :  { %996 = vst [vmem:[#allocation8 + $0x40] sm:$0xff] %v958_v40  ;;  %v961_v46 = vadd.f32 %v1059_v20, %v960_v44 }
 0x469   :  { %999 = vst [vmem:[#allocation8 + $0x58] sm:$0xff] %v969_v43 }
 0x46a   :  { %997 = vst [vmem:[#allocation8 + $0x48] sm:$0xff] %v961_v46 }
 0x46c   :  { %v1258_v47 = vpop.f32.mrb[28].mxu1 }
 0x46d   :  { %v982_v48 = vadd.f32 %v1258_v47, %v1059_v20  ;;  %v973_v49 = vpop.f32.mrb[29].mxu1 }
 0x46e   :  { %v974_v50 = vadd.f32 %v1059_v20, %v973_v49  ;;  %v1259_v51 = vpop.f32.mrb[30].mxu1 }
 0x46f   :  { %1002 = vst [vmem:[#allocation8 + $0x70] sm:$0xff] %v982_v48  ;;  %v985_v52 = vadd.f32 %v1259_v51, %v1059_v20  ;;  %v976_v53 = vpop.f32.mrb[31].mxu1 }
 0x470   :  { %1000 = vst [vmem:[#allocation8 + $0x60] sm:$0xff] %v974_v50  ;;  %v977_v41 = vadd.f32 %v1059_v20, %v976_v53 }
 0x471   :  { %1003 = vst [vmem:[#allocation8 + $0x78] sm:$0xff] %v985_v52 }
 0x472   :  { %1001 = vst [vmem:[#allocation8 + $0x68] sm:$0xff] %v977_v41 }
 0x473   :  { %1365 = shalt.err (!%p1362_p6)
}
 0x474   :  { %s1366_s13 = scalar_lea.hbm %s1599_s8, 2048 }
 0x475   :  { %p1367_p7 = scmp.ne.s32.totalorder %s1599_s8, %s1366_s13  ;;  %p1370_p8 = scmp.lt.u32.totalorder %s1366_s13, %s1599_s8 }
 0x477   :  { %p1372_p9 = pnand %p1370_p8, %p1367_p7 }
 0x479   :  { %1375 = shalt.err (!%p1372_p9)
}
 0x47a   :  { %s1388_s18 = smov 128   ;;  %s1389_s19 = smov 8  }
 0x47b   :  { %1015 = dma.vmem_to_hbm [thread:$0]  %s1010_s10, 2048, %s1599_s8, [#allocation5], %s1388_s18, %s1388_s18, %s1389_s19  }
 0x47c   :  { %1380 = dma.done.wait [#allocation5], 2048  }
 0x47d   :  { %1381 = vsyncadd [#allocation5], 4294965248 }
 0x47e   :  { %1019 = vsyncpa [#allocation4], 1 }
 0x47f   :  { %1020 = vsyncpa [#allocation7], 1 }
 0x480   :  { %1021 = vsyncpa [#allocation5], 1 }

</bundles_post_ra>
